<compile_context>
chip_gen: v7x
topology: tpu7x:2x2x1
jax: 0.10.0
libtpu: 0.0.40
codegen_flags: <defaults>
</compile_context>

<pallas_src>
import jax
import jax.numpy as jnp
from jax.experimental import pallas as pl
from jax.experimental.pallas import tpu as pltpu


def _identity_kernel(x_ref, o_ref):
    # Pure pass-through: the base SSL module defines no transformation.
    o_ref[...] = x_ref[...]


def _choose_lane_width(total: int) -> int | None:
    """Pick a lane-dense width (multiple of 128), preferring rows % 8 == 0."""
    candidates = (2048, 1024, 512, 256, 128)
    # First pass: lane width whose row count is sublane-aligned (multiple of 8).
    for lane in candidates:
        if total % lane == 0 and (total // lane) % 8 == 0:
            return lane
    # Second pass: any lane-dense factorization (full-dim block is still legal).
    for lane in candidates:
        if total % lane == 0:
            return lane
    return None


def ssl_forward(x: jax.Array) -> jax.Array:
    """Pallas 'forward' for the abstract SSL base module (identity copy)."""
    orig_shape = x.shape
    total = x.size
    itemsize = jnp.dtype(x.dtype).itemsize
    lane = _choose_lane_width(total)

    if lane is None or total == 0:
        # Element count not flattenable to a lane-dense 2D view (or empty):
        # a single full-array block (block == full dims) is always legal.
        return pl.pallas_call(
            _identity_kernel,
            out_shape=jax.ShapeDtypeStruct(orig_shape, x.dtype),
            input_output_aliases={0: 0},
        )(x)

    rows = total // lane

    # Cap each block at ~2 MiB.  Keep the row count a multiple of 32 so
    # sub-32-bit dtypes (bf16 / int8 sublane packing) stay aligned; 32 is also
    # a multiple of 8, satisfying the (8, 128) block constraint whenever the
    # block is not the full array.
    target_rows = max(32, (2 * 1024 * 1024) // (lane * itemsize))
    target_rows = (target_rows // 32) * 32
    block_rows = rows if rows <= target_rows else target_rows

    x2d = x.reshape(rows, lane)
    grid = (pl.cdiv(rows, block_rows),)

    y2d = pl.pallas_call(
        _identity_kernel,
        out_shape=jax.ShapeDtypeStruct((rows, lane), x.dtype),
        grid=grid,
        in_specs=[pl.BlockSpec((block_rows, lane), lambda i: (i, 0))],
        out_specs=pl.BlockSpec((block_rows, lane), lambda i: (i, 0)),
        input_output_aliases={0: 0},
        compiler_params=pltpu.CompilerParams(
            dimension_semantics=("parallel",),
        ),
    )(x2d)
    return y2d.reshape(orig_shape)


# Donate the input so the input->output alias actually shares the HBM buffer
# (no defensive copy inserted by XLA).
ssl_forward_jit = jax.jit(ssl_forward, donate_argnums=0)


if __name__ == "__main__":
    key = jax.random.PRNGKey(0)
    # Small NCHW input consistent with a vision SSL model.
    x = jax.random.normal(key, (2, 4, 16, 16), dtype=jnp.float32)

    # Keep an independent copy for the correctness check (x itself is donated).
    x_ref = jnp.copy(x)

    y = ssl_forward_jit(x)
    y = jax.block_until_ready(y)

    # Identity semantics check (the only defined behavior of the base class).
    assert y.shape == x_ref.shape and y.dtype == x_ref.dtype
    assert bool(jnp.allclose(y, x_ref))

    print("KERNEL_OK")
</pallas_src>

<mosaic_0001>
module attributes {stable_mosaic.version = 11 : i64} {
  func.func @_identity_kernel(%arg0: i32, %arg1: memref<8x256xf32, #tpu.memory_space<vmem>>, %arg2: memref<8x256xf32, #tpu.memory_space<vmem>>) attributes {dimension_semantics = [#tpu.dimension_semantics<parallel>], iteration_bounds = array<i64: 1>, scalar_prefetch = 0 : i64, scratch_operands = 0 : i64, tpu.core_type = #tpu.core_type<tc>, window_params = [{transform_indices = @transform_0, window_bounds = array<i64: 8, 256>}, {transform_indices = @transform_1, window_bounds = array<i64: 8, 256>}]} {
    %c0 = arith.constant 0 : index
    %c0_0 = arith.constant 0 : index
    %0 = vector.load %arg1[%c0, %c0_0] : memref<8x256xf32, #tpu.memory_space<vmem>>, vector<8x256xf32>
    %c0_1 = arith.constant 0 : index
    %c0_2 = arith.constant 0 : index
    %1 = vector.load %arg2[%c0_1, %c0_2] : memref<8x256xf32, #tpu.memory_space<vmem>>, vector<8x256xf32>
    tpu.vector_store %arg2[%c0_1, %c0_2], %0 {strides = array<i32>} : memref<8x256xf32, #tpu.memory_space<vmem>>, vector<8x256xf32>,
    return
  }
  func.func @transform_0(%arg0: i32) -> (i32, i32) {
    %c0_i32 = arith.constant 0 : i32
    %c0_i32_0 = arith.constant 0 : i32
    return %arg0, %c0_i32 : i32, i32
  }
  func.func @transform_1(%arg0: i32) -> (i32, i32) {
    %c0_i32 = arith.constant 0 : i32
    %c0_i32_0 = arith.constant 0 : i32
    return %arg0, %c0_i32 : i32, i32
  }
}

</mosaic_0001>

<bundles_post_ra>
// kernel: ssl_forward.1
= control target key start
LH: loop header
LB: loop body
LE: loop exit
PB: predicated region body
PF: predicated region fallthrough
CT: control target
= control target key end

     0   :  { %s38_s0 = inlined_call_operand.vmem [shape: f32[8,256], index: 0, kind: input, shape index: {}, may-alias: {0,1}]   ;;  %s39_s1 = inlined_call_operand.vmem [shape: f32[8,256], index: 1, kind: output, shape index: {}, may-alias: {0,1}]  }
   0x1   :  { %v8_v0 = vld [vmem:[%s38_s0] sm:$0xff]  ;;  %v9_v1 = vld [vmem:[%s38_s0 + $0x8] sm:$0xff] }
   0x2   :  { %10 = vst [vmem:[%s39_s1] sm:$0xff] %v8_v0  ;;  %11 = vst [vmem:[%s39_s1 + $0x8] sm:$0xff] %v9_v1 }

</bundles_post_ra>
